<compile_context>
chip_gen: v7x
topology: tpu7x:2x2x1
jax: 0.10.0
libtpu: 0.0.40
codegen_flags: <defaults>
</compile_context>

<pallas_src>
import jax
import jax.numpy as jnp
from jax.experimental import pallas as pl
from jax.experimental.pallas import tpu as pltpu

_MEAN = (0.485, 0.456, 0.406)   # RGB mean: compile-time constants, no DMA
_SCALE = 0.6

_LANE = 128                      # vreg lane width (last block dim granularity)
_SUBLANE = 8                     # vreg sublane count (2nd-to-last granularity)
_TARGET_VMEM_BLOCK = 4 << 20     # ~4 MiB VMEM per block side (x4 buffers ~= 16 MiB)
_MIN_BLOCK = 1 << 20             # keep blocks >= ~1 MiB when splitting for step count
_MIN_STEPS = 8                   # DMA overlap + both v7x TensorCores
_VMEM_LIMIT_BYTES = 32 * 1024 * 1024   # safe scoped-VMEM limit on v5e/v6e/v7x


def _cdiv(a, b):
    return -(-a // b)


def _round_up(a, b):
    return _cdiv(a, b) * b


def _postprocessing_kernel(x_ref, o_ref):
    """One (row_tile, hw_tile) block of the (N*C, H*W) view.

    y = clamp(x * 0.6 + mean[channel], 0, 1), channel = global_row % 3.
    """
    row_tile = x_ref.shape[0]
    r0 = pl.program_id(0) * row_tile
    # Per-row channel -> per-row mean: tiny (row_tile, 1) iota + two selects.
    # The lane-broadcast against the (row_tile, hw_tile) block happens in the
    # fused multiply-add below; all of this is VPU work hidden under the DMAs.
    row = jax.lax.broadcasted_iota(jnp.int32, (row_tile, 1), 0) + r0
    ch = row % 3
    mean = jnp.where(ch == 0, _MEAN[0],
                     jnp.where(ch == 1, _MEAN[1], _MEAN[2])).astype(jnp.float32)
    x = x_ref[...].astype(jnp.float32)
    y = jnp.clip(x * jnp.float32(_SCALE) + mean, 0.0, 1.0)
    o_ref[...] = y.astype(o_ref.dtype)


def post_processing(x: jax.Array, *, donate_input: bool = False) -> jax.Array:
    """x: (N, 3, H, W) floating array. Returns clamp(x*0.6 + mean, 0, 1)."""
    N, C, H, W = x.shape
    if C != 3:
        raise ValueError("PostProcessing expects 3 channels (RGB mean).")
    if not jnp.issubdtype(x.dtype, jnp.floating):
        raise TypeError("PostProcessing expects a floating-point input dtype.")

    R, HW = N * C, H * W
    itemsize = jnp.dtype(x.dtype).itemsize
    x2 = x.reshape(R, HW)          # contiguous view: no extra HBM pass

    lane_groups = _cdiv(HW, _LANE)
    row_groups = _cdiv(R, _SUBLANE)
    payload_bytes = R * HW * itemsize                          # real HBM traffic (one way)
    padded_bytes = row_groups * lane_groups * _SUBLANE * _LANE * itemsize  # VMEM footprint

    # How finely can we legally split? Rows split in multiples of 8 sublanes
    # (only if R > 8; otherwise the full extent is the only legal row block).
    max_row_splits = row_groups if R > _SUBLANE else 1
    max_splits = max_row_splits * lane_groups

    want_steps = max(
        _cdiv(padded_bytes, _TARGET_VMEM_BLOCK),               # cap VMEM block size
        min(_MIN_STEPS, _cdiv(payload_bytes, _MIN_BLOCK)),     # >=4..8 steps for overlap
        min(2, max_splits),                                    # both v7x TCs get work
    )
    want_steps = min(want_steps, max_splits)

    # Split the lane (H*W) axis first: keeps rows whole and lanes dense; the
    # ragged tail (HW % tile != 0) becomes one masked edge block — no host pad.
    grid_h = max(1, min(lane_groups, want_steps))
    hw_tile_groups = _cdiv(lane_groups, grid_h)
    if hw_tile_groups * _LANE >= HW:
        hw_tile, grid_h = HW, 1            # full extent: always a legal block dim
    else:
        hw_tile = hw_tile_groups * _LANE   # multiple of 128
        grid_h = _cdiv(HW, hw_tile)

    # Put any remaining split on the row (N*C) axis, in multiples of 8 sublanes.
    grid_r = min(max_row_splits, _cdiv(want_steps, grid_h))
    if grid_r <= 1:
        row_tile, grid_r = R, 1            # full extent: legal for any R
    else:
        row_tile = _round_up(_cdiv(R, grid_r), _SUBLANE)
        grid_r = _cdiv(R, row_tile)

    block = (row_tile, hw_tile)
    extra = {}
    if donate_input:
        # Callers that no longer need `x` can write the result in place
        # (no second full-size HBM buffer).
        extra["input_output_aliases"] = {0: 0}

    out2 = pl.pallas_call(
        _postprocessing_kernel,
        out_shape=jax.ShapeDtypeStruct((R, HW), x.dtype),
        grid=(grid_r, grid_h),
        in_specs=[pl.BlockSpec(block, lambda r, h: (r, h))],
        out_specs=pl.BlockSpec(block, lambda r, h: (r, h)),
        compiler_params=pltpu.CompilerParams(
            dimension_semantics=("parallel", "parallel"),
            vmem_limit_bytes=_VMEM_LIMIT_BYTES,
        ),
        cost_estimate=pl.CostEstimate(
            flops=4 * x.size,
            transcendentals=0,
            bytes_accessed=2 * x.size * itemsize,
        ),
        **extra,
    )(x2)

    return out2.reshape(N, C, H, W)


if __name__ == "__main__":
    key = jax.random.PRNGKey(0)
    # Small NCHW input consistent with the module (image-like, 3 channels).
    x = jax.random.normal(key, (2, 3, 16, 16), dtype=jnp.float32)

    out = jax.block_until_ready(post_processing(x))

    # Pure-JAX reference check.
    mean_ref = jnp.asarray(_MEAN, dtype=jnp.float32).reshape(1, 3, 1, 1)
    ref = jnp.clip(x * _SCALE + mean_ref, 0.0, 1.0)
    assert out.shape == x.shape and out.dtype == x.dtype
    assert jnp.allclose(out, ref, atol=1e-6), "mismatch vs reference"

    # Ragged H*W (not a multiple of 128): exercises the masked-tail path that
    # replaced the old host-side pad/slice.
    x_ragged = jax.random.normal(jax.random.PRNGKey(0), (1, 3, 15, 17),
                                 dtype=jnp.float32)
    out_ragged = jax.block_until_ready(post_processing(x_ragged))
    ref_ragged = jnp.clip(x_ragged * _SCALE + mean_ref, 0.0, 1.0)
    assert jnp.allclose(out_ragged, ref_ragged, atol=1e-6), "mismatch (ragged)"

    print("KERNEL_OK")
</pallas_src>

<mosaic_0001>
module attributes {stable_mosaic.version = 11 : i64} {
  func.func @_postprocessing_kernel(%arg0: i32, %arg1: i32, %arg2: memref<6x128xf32, #tpu.memory_space<vmem>>, %arg3: memref<6x128xf32, #tpu.memory_space<vmem>>) attributes {dimension_semantics = [#tpu.dimension_semantics<parallel>, #tpu.dimension_semantics<parallel>], iteration_bounds = array<i64: 1, 2>, scalar_prefetch = 0 : i64, scratch_operands = 0 : i64, tpu.core_type = #tpu.core_type<tc>, window_params = [{transform_indices = @transform_0, window_bounds = array<i64: 6, 128>}, {transform_indices = @transform_1, window_bounds = array<i64: 6, 128>}]} {
    %c6_i32 = arith.constant 6 : i32
    %0 = arith.muli %arg0, %c6_i32 : i32
    %1 = tpu.iota {dimensions = array<i32: 0>} : vector<6x1xi32>
    %2 = vector.broadcast %0 : i32 to vector<6x1xi32>
    %3 = arith.addi %1, %2 : vector<6x1xi32>
    %c3_i32 = arith.constant 3 : i32
    %c0_i32 = arith.constant 0 : i32
    %4 = arith.cmpi eq, %c3_i32, %c0_i32 : i32
    %c1_i32 = arith.constant 1 : i32
    %5 = arith.select %4, %c1_i32, %c3_i32 : i32
    %6 = vector.broadcast %5 : i32 to vector<6x1xi32>
    %7 = arith.remsi %3, %6 : vector<6x1xi32>
    %c0_i32_0 = arith.constant 0 : i32
    %8 = vector.broadcast %c0_i32_0 : i32 to vector<6x1xi32>
    %9 = arith.cmpi ne, %7, %8 : vector<6x1xi32>
    %c0_i32_1 = arith.constant 0 : i32
    %10 = vector.broadcast %c0_i32_1 : i32 to vector<6x1xi32>
    %11 = arith.cmpi slt, %7, %10 : vector<6x1xi32>
    %c0_i32_2 = arith.constant 0 : i32
    %12 = arith.cmpi slt, %5, %c0_i32_2 : i32
    %13 = vector.broadcast %12 : i1 to vector<6x1xi1>
    %14 = vector.broadcast %13 : vector<6x1xi1> to vector<6x1xi1>
    %15 = arith.xori %11, %14 : vector<6x1xi1>
    %16 = arith.andi %15, %9 : vector<6x1xi1>
    %17 = vector.broadcast %5 : i32 to vector<6x1xi32>
    %18 = arith.addi %7, %17 : vector<6x1xi32>
    %19 = arith.select %16, %18, %7 : vector<6x1xi1>, vector<6x1xi32>
    %c0_i32_3 = arith.constant 0 : i32
    %20 = vector.broadcast %c0_i32_3 : i32 to vector<6x1xi32>
    %21 = arith.cmpi eq, %19, %20 : vector<6x1xi32>
    %c1_i32_4 = arith.constant 1 : i32
    %22 = vector.broadcast %c1_i32_4 : i32 to vector<6x1xi32>
    %23 = arith.cmpi eq, %19, %22 : vector<6x1xi32>
    %cst = arith.constant 4.560000e-01 : f32
    %cst_5 = arith.constant 4.060000e-01 : f32
    %24 = vector.broadcast %cst : f32 to vector<6x1xf32>
    %25 = vector.broadcast %cst_5 : f32 to vector<6x1xf32>
    %26 = arith.select %23, %24, %25 : vector<6x1xi1>, vector<6x1xf32>
    %cst_6 = arith.constant 4.850000e-01 : f32
    %27 = vector.broadcast %cst_6 : f32 to vector<6x1xf32>
    %28 = arith.select %21, %27, %26 : vector<6x1xi1>, vector<6x1xf32>
    %c0 = arith.constant 0 : index
    %c0_7 = arith.constant 0 : index
    %29 = vector.load %arg2[%c0, %c0_7] : memref<6x128xf32, #tpu.memory_space<vmem>>, vector<6x128xf32>
    %cst_8 = arith.constant 6.000000e-01 : f32
    %30 = vector.broadcast %cst_8 : f32 to vector<6x128xf32>
    %31 = arith.mulf %29, %30 : vector<6x128xf32>
    %32 = vector.broadcast %28 : vector<6x1xf32> to vector<6x128xf32>
    %33 = arith.addf %31, %32 : vector<6x128xf32>
    %cst_9 = arith.constant 0.000000e+00 : f32
    %cst_10 = arith.constant 1.000000e+00 : f32
    %34 = vector.broadcast %cst_9 : f32 to vector<6x128xf32>
    %35 = arith.maximumf %34, %33 : vector<6x128xf32>
    %36 = vector.broadcast %cst_10 : f32 to vector<6x128xf32>
    %37 = arith.minimumf %36, %35 : vector<6x128xf32>
    %c0_11 = arith.constant 0 : index
    %c0_12 = arith.constant 0 : index
    %38 = vector.load %arg3[%c0_11, %c0_12] : memref<6x128xf32, #tpu.memory_space<vmem>>, vector<6x128xf32>
    tpu.vector_store %arg3[%c0_11, %c0_12], %37 {strides = array<i32>} : memref<6x128xf32, #tpu.memory_space<vmem>>, vector<6x128xf32>,
    return
  }
  func.func @transform_0(%arg0: i32, %arg1: i32) -> (i32, i32) {
    %c0_i32 = arith.constant 0 : i32
    return %arg0, %arg1 : i32, i32
  }
  func.func @transform_1(%arg0: i32, %arg1: i32) -> (i32, i32) {
    %c0_i32 = arith.constant 0 : i32
    return %arg0, %arg1 : i32, i32
  }
}

</mosaic_0001>

<bundles_post_ra>
// kernel: tpu_custom_call.1
= control target key start
LH: loop header
LB: loop body
LE: loop exit
PB: predicated region body
PF: predicated region fallthrough
CT: control target
= control target key end

     0   :  { %6 = vsyncpa [#allocation3], 0  ;;  %s660_s0 = inlined_call_operand.hbm [shape: f32[6,256], index: 0, kind: input, shape index: {}]   ;;  %s661_s1 = inlined_call_operand.hbm [shape: f32[6,256], index: 1, kind: output, shape index: {}]  }
   0x1   :  { %8 = vsyncpa [#allocation3 + $0x1], 0 }
   0x2   :  { %9 = vsyncpa [#allocation4], 0 }
   0x3   :  { %11 = vsyncpa [#allocation4 + $0x1], 0  ;;  %s484_s6 = smov 0   ;;  %s486_s7 = smov 0  }
   0x4   :  { %s488_s8 = smov 0   ;;  %s490_s9 = smov 0  }
   0x5   :  { %s492_s10 = smov 0   ;;  %s494_s11 = smov 0  }
   0x6 LB: > { %s279_s12 = sadd.s32 4294967295, %s469_s11   ;;  %s280_s13 = sadd.s32 4294967294, %s469_s11   ;;  %s469_s11 = sphi %s494_s11, %s17_s11   ;;  %s465_s10 = sphi %s492_s10, %s677_s10   ;;  %s461_s9 = sphi %s490_s9, %s676_s9   ;;  %s457_s8 = sphi %s488_s8, %s675_s8   ;;  %s453_s7 = sphi %s486_s7, %s674_s7   ;;  %s449_s6 = sphi %s484_s6, %s673_s6  }
   0x7   : > { %s26_s14 = sadd.s32 1, %s465_s10  ;;  %s38_s15 = sadd.s32 1, %s457_s8 }
   0x8   : > { %p27_p0 = scmp.ge.s32.totalorder %s26_s14, 2  ;;  %p45_p1 = scmp.ne.s32.totalorder %s457_s8, %s453_s7 }
   0x9   : > { %p46_p2 = scmp.eq.s32.totalorder %s469_s11, 0  ;;  %p51_p3 = scmp.ne.s32.totalorder %s453_s7, %s449_s6 }
   0xa   : > { %s679_s14 = smov (%p27_p0, %s26_s14), 0  ;;  %p52_p5 = scmp.eq.s32.totalorder %s279_s12, 0 }
   0xb   : > { %p525_p4 = por %p46_p2, %p45_p1  ;;  %s34_s17 = ssub.s32 %s465_s10, %s679_s14 }
   0xc   : > { %p77_p6 = scmp.eq.s32.totalorder %s279_s12, 1  ;;  %p36_p7 = scmp.eq.s32.totalorder %s34_s17, 0 }
   0xd   : > { %p531_p8 = por %p52_p5, %p51_p3  ;;  %p83_p10 = scmp.eq.s32.totalorder %s280_s13, 1 }
   0xe   : > { %p535_p9 = por %p77_p6, %p45_p1  ;;  %p306_p13 = scmp.lt.s32.totalorder %s469_s11, 2 }
   0xf   : > { %s540_s20 = scalar_select %p36_p7, %s457_s8, %s38_s15  }
  0x10   : > { %s665_s19 = scalar_select %p535_p9, 1, 0 }
  0x11   : > { %p542_p11 = por %p83_p10, %p51_p3  ;;  %s103_s22 = sand.u32 1, %s457_s8  }
  0x12   : > { %s283_s23 = sshll.u32 %s103_s22, 3  ;;  %s284_s24 = sshll.u32 %s465_s10, 7 }
  0x13   : > { %s666_s21 = scalar_select %p542_p11, 1, 0 }
  0x14   : > { %s553_s27 = scalar_lea.hbm %s660_s0, %s284_s24  ;;  %s107_s28 = scalar_lea.vmem [#allocation2], %s283_s23 }
  0x15   : > { %s116_s29 = sshll.u32 %s107_s28, 4  ;;  %p559_p0 = pnand %p306_p13, %p525_p4  ;;  %s555_s29 = int_to_ptr.vmem [resolvable:$true] %s116_s29 }
  0x16   : > { %s104_s2 = scalar_lea.sflag [#allocation3], %s103_s22  ;;  %s357_s3 = scalar_lea.hbm %s553_s27, 128 }
  0x17   : > { %p358_p3 = scmp.ne.s32.totalorder %s553_s27, %s357_s3  ;;  %p359_p5 = pneg %p559_p0 }
  0x18   : > { %s362_s12 = scalar_lea.hbm %s660_s0, 256  ;;  %p363_p4 = scmp.lt.u32.totalorder %s553_s27, %s660_s0 }
  0x19   : > { %p360_p6 = pnand %p359_p5, %p358_p3  ;;  %p364_p10 = scmp.lt.u32.totalorder %s362_s12, %s357_s3 }
  0x1a   : > { %p366_p12 = scmp.lt.u32.totalorder %s357_s3, %s553_s27 }
  0x1b   : > { %p361_p7 = pneg %p360_p6  ;;  %p365_p13 = por %p364_p10, %p363_p4 }
  0x1d   : > { %p367_p1 = por %p366_p12, %p365_p13 }
  0x1f   : > { %p368_p2 = pnand %p367_p1, %p361_p7 }
  0x21   : > { %371 = shalt.err (!%p368_p2)
}
  0x22   : > { %s372_s16 = scalar_lea.vmem %s555_s29, 128  ;;  %s471_s17 = smov [#allocation2]  }
  0x23   : > { %p373_p3 = scmp.ne.s32.totalorder %s555_s29, %s372_s16  ;;  %s377_s22 = sshll.u32 %s471_s17, 4  ;;  %s378_s22 = int_to_ptr.vmem [resolvable:$false] %s377_s22 }
  0x24   : > { %s379_s23 = scalar_lea.vmem %s378_s22, 256  ;;  %p380_p9 = scmp.lt.s32.totalorder %s555_s29, %s378_s22 }
  0x25   : > { %p375_p6 = pnand %p373_p3, %p359_p5  ;;  %p381_p4 = scmp.lt.s32.totalorder %s379_s23, %s372_s16 }
  0x27   : > { %p376_p11 = pneg %p375_p6  ;;  %p382_p10 = por %p381_p4, %p380_p9 }
  0x29   : > { %p383_p12 = pnand %p382_p10, %p376_p11 }
  0x2b   : > { %386 = shalt.err (!%p383_p12)
}
  0x2c   : > { %301 = dma.hbm_to_vmem [thread:$0]  (!%p559_p0), %s553_s27, 128, %s555_s29, %s104_s2  }
  0x2d   : > { %p668_p1 = scmp.lt.s32.totalorder %s469_s11, 3  ;;  %p669_p2 = scmp.ge.s32.totalorder %s469_s11, 1 }
  0x2f   : > { %p122_p5 = pnand %p669_p2, %p668_p1 }
  0x30   : > { %s595_s24 = sand.u32 (!%p122_p5), 1, %s453_s7  }
  0x31   : > { %125 = sbr.rel (%p122_p5) target bundleno = 95 (0x5f), region = 24  ;;  %s286_s25 = sshll.u32 (!%p122_p5), %s595_s24, 3 }
  0x32   : > { %s128_s26 = scalar_lea.sflag (!%p122_p5), [#allocation3], %s595_s24  ;;  %s131_s28 = scalar_lea.vmem (!%p122_p5), [#allocation2], %s286_s25 }
  0x38   : > { %440 = dma.done.wait (%p531_p8), %s128_s26, 128  }
  0x39   : > { %442 = vsyncadd (%p531_p8), %s128_s26, 4294967168  ;;  %v151_v0 = vlaneseq  ;;  %v175_v7 = vld [vmem:[%s131_s28] sm:$0x3f]  ;;  %v472_v11 = vmov 0.406   ;;  %s149_s18 = scalar_lea.vmem [#allocation5], %s286_s25 }
  0x3a   : > { %v176_v10 = vmul.f32 0.6, %v175_v7  ;;  %s197_s27 = sshll.u32 %s149_s18, 4  ;;  %s289_s29 = sshll.u32 %s461_s9, 7  ;;  %s608_s27 = int_to_ptr.vmem [resolvable:$true] %s197_s27 }
  0x3b   : > { %v152_v1 = vshrl.u32 %v151_v0, 7  ;;  %s613_s3 = scalar_lea.hbm %s661_s1, %s289_s29  ;;  %s182_s4 = scalar_lea.sflag [#allocation4], %s595_s24 }
  0x3c   : > { %s387_s5 = scalar_lea.vmem %s608_s27, 128  ;;  %p670_p9 = scmp.ne.s32.totalorder %s665_s19, 0 }
  0x3d   : > { %v603_v2 = vmul.u32.u64.low 2863311531, %v152_v1  ;;  %v604_v3 = vmul.u32.u64.high 2863311531, %v152_v1, %v603_v2  ;;  %p388_p8 = scmp.ne.s32.totalorder %s608_s27, %s387_s5  ;;  %s473_s9 = smov [#allocation5]  }
  0x3e   : > { %s391_s12 = sshll.u32 %s473_s9, 4  ;;  %s392_s12 = int_to_ptr.vmem [resolvable:$false] %s391_s12 }
  0x3f   : > { %v161_v4 = vshrl.u32 %v604_v3, 1  ;;  %p389_p11 = pnand %p388_p8, %p670_p9  ;;  %s393_s13 = scalar_lea.vmem %s392_s12, 256 }
  0x40   : > { %p394_p7 = scmp.lt.s32.totalorder %s608_s27, %s392_s12  ;;  %p395_p13 = scmp.lt.s32.totalorder %s393_s13, %s387_s5 }
  0x41   : > { %v162_v5 = vmul.u32 3, %v161_v4  ;;  %p390_p0 = pneg %p389_p11 }
  0x42   : > { %p396_p3 = por %p395_p13, %p394_p7 }
  0x43   : > { %v163_v6 = vsub.s32 %v152_v1, %v162_v5 }
  0x44   : > { %p397_p6 = pnand %p396_p3, %p390_p0 }
  0x45   : > { %vm166_vm0 = vcmp.ne.s32.totalorder %v163_v6, 0  ;;  %vm167_vm1 = vcmp.lt.s32.totalorder %v163_v6, 0  ;;  %v169_v8 = vadd.s32 3, %v163_v6 }
  0x46   : > { %vm168_vm2 = vmand %vm167_vm1, %vm166_vm0 }
  0x47   : > { %v170_v9 = vsel %vm168_vm2, %v169_v8, %v163_v6 }
  0x48   : > { %vm171_vm3 = vcmp.eq.s32.totalorder %v170_v9, 0  ;;  %vm172_vm4 = vcmp.eq.s32.totalorder %v170_v9, 1 }
  0x49   : > { %v173_v12 = vsel %vm172_vm4, 0.456, %v472_v11 }
  0x4a   : > { %v174_v13 = vsel %vm171_vm3, 0.485, %v173_v12 }
  0x4b   : > { %v177_v14 = vadd.f32 %v176_v10, %v174_v13 }
  0x4d   : > { %v178_v15 = vmax.f32 %v177_v14, 0.0 }
  0x4f   : > { %v179_v16 = vmin.f32 %v178_v15, 1.0 }
  0x51   : > { %180 = vst [vmem:[%s149_s18] sm:$0x3f] %v179_v16 }
  0x52   : > { %400 = shalt.err (!%p397_p6)
}
  0x53   : > { %s401_s15 = scalar_lea.hbm %s613_s3, 128  ;;  %s405_s22 = scalar_lea.hbm %s661_s1, 256 }
  0x54   : > { %p402_p4 = scmp.ne.s32.totalorder %s613_s3, %s401_s15  ;;  %p406_p1 = scmp.lt.u32.totalorder %s613_s3, %s661_s1 }
  0x55   : > { %p407_p2 = scmp.lt.u32.totalorder %s405_s22, %s401_s15  ;;  %p409_p8 = scmp.lt.u32.totalorder %s401_s15, %s613_s3 }
  0x56   : > { %p403_p10 = pnand %p402_p4, %p670_p9 }
  0x57   : > { %p408_p5 = por %p407_p2, %p406_p1 }
  0x58   : > { %p404_p12 = pneg %p403_p10 }
  0x59   : > { %p410_p11 = por %p409_p8, %p408_p5 }
  0x5b   : > { %p411_p0 = pnand %p410_p11, %p404_p12 }
  0x5d   : > { %414 = shalt.err (!%p411_p0)
}
  0x5e   : > { %296 = dma.vmem_to_hbm [thread:$0]  (%p670_p9), %s608_s27, 128, %s613_s3, %s182_s4  }
  0x5f PF: > { %s209_s25 = sand.u32 1, %s449_s6   ;;  %p671_p7 = scmp.ne.s32.totalorder %s666_s21, 0 }
  0x60   : > { %p672_p13 = scmp.ge.s32.totalorder %s469_s11, 2  ;;  %s210_s26 = scalar_lea.sflag [#allocation4], %s209_s25 }
  0x62   : > { %p303_p3 = pnand %p672_p13, %p671_p7 }
  0x64   : > { %444 = dma.done.wait (!%p303_p3), %s210_s26, 128  }
  0x65   : > { %446 = vsyncadd (!%p303_p3), %s210_s26, 4294967168  ;;  %s17_s11 = sadd.s32 1, %s469_s11   ;;  %s673_s6 = smov %s453_s7 }
  0x66   : > { %p14_p6 = scmp.ge.s32.totalorder %s17_s11, 4   ;;  %s674_s7 = smov %s457_s8 }
  0x67   : > { %s675_s8 = smov %s540_s20  ;;  %s676_s9 = smov %s465_s10 }
  0x68   : > { %s677_s10 = smov %s679_s14  ;;  %16 = sbr.rel (!%p14_p6) target bundleno = 6 (0x6), region = 69 }
  0x6f   :  { %215 = vsyncpa [#allocation3], 1 }
  0x70   :  { %217 = vsyncpa [#allocation3 + $0x1], 1 }
  0x71   :  { %218 = vsyncpa [#allocation4], 1 }
  0x72   :  { %220 = vsyncpa [#allocation4 + $0x1], 1 }

</bundles_post_ra>
